<compile_context>
chip_gen: v7x
topology: tpu7x:2x2x1
jax: 0.10.0
libtpu: 0.0.40
codegen_flags: <defaults>
</compile_context>

<pallas_src>
import functools

import jax
import jax.numpy as jnp
from jax.experimental import pallas as pl
from jax.experimental.pallas import tpu as pltpu

_EPS = 1e-5  # SynchronizedBatchNorm2d default eps


# --------------------------------------------------------------------------
# Kernel A: fused (1x1 conv | dilated 3x3 conv) matmul + bias + BN partials
# --------------------------------------------------------------------------
def _conv_stats_kernel(p_ref, w_ref, b_ref, y_ref, st_ref):
    # p_ref : (TILE, Kp)   bf16 im2col patches
    # w_ref : (Kp, 2*Cp)   bf16 block-diagonal packed weights
    # b_ref : (1, 2*Cp)    f32 packed biases
    # y_ref : (TILE, 2*Cp) f32 packed conv outputs (branch1 | branch2)
    # st_ref: (1, 8, 2*Cp) f32 per-tile BN partials (row0=sum, row1=sumsq)
    y = jnp.dot(p_ref[...], w_ref[...], preferred_element_type=jnp.float32)
    y = y + b_ref[...]
    y_ref[...] = y
    s = jnp.sum(y, axis=0, keepdims=True)
    ss = jnp.sum(y * y, axis=0, keepdims=True)
    pad = jnp.zeros((6, y.shape[1]), jnp.float32)
    st_ref[...] = jnp.concatenate([s, ss, pad], axis=0)[None]


# --------------------------------------------------------------------------
# Kernel B: folded BN + ReLU + branch add + per-batch spatial-sum accumulator
# --------------------------------------------------------------------------
def _fuse_pool_kernel(y_ref, sc_ref, sh_ref, gp_ref, *, cp, tile_r):
    ti = pl.program_id(1)

    @pl.when(ti == 0)
    def _():
        gp_ref[...] = jnp.zeros_like(gp_ref)

    y = y_ref[...]                                          # (TILE, 2*Cp)
    f = jnp.maximum(y * sc_ref[...] + sh_ref[...], 0.0)     # folded BN + ReLU
    fuse = f[:, :cp] + f[:, cp:]                            # (TILE, Cp)
    # keep the reduction 8-sublane aligned; final 8-way sum happens in JAX
    part = jnp.sum(fuse.reshape(tile_r // 8, 8, cp), axis=0)
    gp_ref[...] = gp_ref[...] + part[None]


# --------------------------------------------------------------------------
# Kernel C: attention reweighting + sigmoid + category attention add
# --------------------------------------------------------------------------
def _attend_kernel(y_ref, att_ref, cat_ref, o_ref, *, cp):
    y = y_ref[...]                                          # (TILE, 2*Cp)
    a = att_ref[...][0, 0:1, :]                             # (1, 2*Cp)
    c = cat_ref[...][0, 0:1, :]                             # (1, Cp)
    w = y * a
    s = w[:, :cp] + w[:, cp:]                               # (TILE, Cp)
    spatial = 1.0 / (1.0 + jnp.exp(-s))                     # sigmoid (EUP)
    o_ref[...] = spatial + c


def _pick_tile(hw):
    """Largest divisor of H*W that is a multiple of 8 and <= 512."""
    best = None
    for t in range(8, min(hw, 512) + 1, 8):
        if hw % t == 0:
            best = t
    if best is None:
        raise ValueError("H*W must be a multiple of 8")
    return best


# --------------------------------------------------------------------------
# Wrapper
# --------------------------------------------------------------------------
def multiscale_encoder(x, p, *, rate=1, eps=_EPS):
    """Forward pass of _MultiscaleEncoder.

    x : (N, Cin, H, W) float32 (PyTorch NCHW)
    p : dict of parameters (PyTorch layouts, see __main__)
    returns (N, Cout, H, W) float32
    """
    f32 = jnp.float32
    B, Cin, H, W = x.shape
    Cout = p["w1"].shape[0]
    HW = H * W
    R = B * HW
    Cp = ((Cout + 127) // 128) * 128          # per-branch padded channels
    K = 10 * Cin                              # 1x1 patch + 9 dilated taps
    Kp = ((K + 15) // 16) * 16
    TILE = _pick_tile(HW)
    n_hw = HW // TILE
    n_tiles = R // TILE
    vmem_limit = 32 * 1024 * 1024

    x_nhwc = jnp.transpose(x, (0, 2, 3, 1)).astype(f32)     # (B,H,W,Cin)

    # ---- im2col (channels-last): [x | 9 dilated 3x3 taps] ----
    r = rate
    xpad = jnp.pad(x_nhwc, ((0, 0), (r, r), (r, r), (0, 0)))
    taps = [x_nhwc] + [xpad[:, ky * r:ky * r + H, kx * r:kx * r + W, :]
                       for ky in range(3) for kx in range(3)]
    patches = jnp.concatenate(taps, axis=-1).reshape(R, K)
    patches = jnp.pad(patches, ((0, 0), (0, Kp - K))).astype(jnp.bfloat16)

    # ---- pack weights block-diagonally: branch1 cols [0,Cout), branch2 cols [Cp,Cp+Cout) ----
    wbig = jnp.zeros((Kp, 2 * Cp), f32)
    wbig = wbig.at[:Cin, :Cout].set(p["w1"].T)
    for ky in range(3):
        for kx in range(3):
            r0 = Cin * (1 + 3 * ky + kx)
            wbig = wbig.at[r0:r0 + Cin, Cp:Cp + Cout].set(p["w2"][:, :, ky, kx].T)
    wbig = wbig.astype(jnp.bfloat16)
    bias = (jnp.zeros((1, 2 * Cp), f32)
            .at[0, :Cout].set(p["b1"]).at[0, Cp:Cp + Cout].set(p["b2"]))

    # ---- pass 1: conv matmul + bias + BN partial sums ----
    y12, stats = pl.pallas_call(
        _conv_stats_kernel,
        out_shape=(jax.ShapeDtypeStruct((R, 2 * Cp), f32),
                   jax.ShapeDtypeStruct((n_tiles, 8, 2 * Cp), f32)),
        grid_spec=pltpu.PrefetchScalarGridSpec(
            num_scalar_prefetch=0,
            grid=(n_tiles,),
            in_specs=[pl.BlockSpec((TILE, Kp), lambda i: (i, 0)),
                      pl.BlockSpec((Kp, 2 * Cp), lambda i: (0, 0)),
                      pl.BlockSpec((1, 2 * Cp), lambda i: (0, 0))],
            out_specs=(pl.BlockSpec((TILE, 2 * Cp), lambda i: (i, 0)),
                       pl.BlockSpec((1, 8, 2 * Cp), lambda i: (i, 0, 0)))),
        compiler_params=pltpu.CompilerParams(
            dimension_semantics=("parallel",),
            vmem_limit_bytes=vmem_limit),
        cost_estimate=pl.CostEstimate(
            flops=int(2 * R * Kp * 2 * Cp),
            transcendentals=0,
            bytes_accessed=int(patches.size * 2 + wbig.size * 2
                               + R * 2 * Cp * 4 + n_tiles * 8 * 2 * Cp * 4)),
    )(patches, wbig, bias)

    # ---- fold BN into one scale/shift per packed channel ----
    stat = jnp.sum(stats, axis=0)                    # (8, 2*Cp)
    mean = stat[0] / R
    var = jnp.maximum(stat[1] / R - mean * mean, 0.0)
    gamma_p = (jnp.zeros((2 * Cp,), f32)
               .at[:Cout].set(p["g1"]).at[Cp:Cp + Cout].set(p["g2"]))
    beta_p = (jnp.zeros((2 * Cp,), f32)
              .at[:Cout].set(p["be1"]).at[Cp:Cp + Cout].set(p["be2"]))
    scale = gamma_p * jax.lax.rsqrt(var + eps)
    shift = beta_p - mean * scale

    # ---- pass 2: fuse = relu(bn1)+relu(bn2), per-batch global average pool ----
    gp_sums = pl.pallas_call(
        functools.partial(_fuse_pool_kernel, cp=Cp, tile_r=TILE),
        out_shape=jax.ShapeDtypeStruct((B, 8, Cp), f32),
        grid_spec=pltpu.PrefetchScalarGridSpec(
            num_scalar_prefetch=0,
            grid=(B, n_hw),
            in_specs=[pl.BlockSpec((TILE, 2 * Cp),
                                   lambda bi, ti: (bi * n_hw + ti, 0)),
                      pl.BlockSpec((1, 2 * Cp), lambda bi, ti: (0, 0)),
                      pl.BlockSpec((1, 2 * Cp), lambda bi, ti: (0, 0))],
            out_specs=pl.BlockSpec((1, 8, Cp), lambda bi, ti: (bi, 0, 0))),
        compiler_params=pltpu.CompilerParams(
            dimension_semantics=("parallel", "arbitrary"),
            vmem_limit_bytes=vmem_limit),
        cost_estimate=pl.CostEstimate(
            flops=int(4 * R * 2 * Cp),
            transcendentals=0,
            bytes_accessed=int(R * 2 * Cp * 4 + B * 8 * Cp * 4)),
    )(y12, scale.reshape(1, 2 * Cp), shift.reshape(1, 2 * Cp))
    gp = jnp.sum(gp_sums, axis=1)[:, :Cout] / HW              # (B, Cout)

    # ---- tiny per-batch MLP path (plain JAX) ----
    v_pre = gp @ p["wfc"].T                                   # (B, dim_min)
    vm = jnp.mean(v_pre, axis=0)
    vv = jnp.mean((v_pre - vm) ** 2, axis=0)
    v = jnp.maximum((v_pre - vm) * jax.lax.rsqrt(vv + eps) * p["gfc"] + p["bfc"], 0.0)
    v1 = v @ p["wfc1"].T
    v2 = v @ p["wfc2"].T
    mx = jnp.maximum(v1, v2)
    e1 = jnp.exp(v1 - mx)
    e2 = jnp.exp(v2 - mx)
    a1 = e1 / (e1 + e2)
    a2 = e2 / (e1 + e2)                                       # (B, Cout)

    ca = jnp.mean(x_nhwc, axis=(1, 2))                        # (B, Cin)
    cm = jnp.max(x_nhwc, axis=(1, 2))
    cat_logit = (ca + cm) @ p["wcat"].T + 2.0 * p["bcat"]
    cat = 1.0 / (1.0 + jnp.exp(-cat_logit))                   # (B, Cout)

    att_p = (jnp.zeros((B, 2 * Cp), f32)
             .at[:, :Cout].set(a1).at[:, Cp:Cp + Cout].set(a2))
    att_in = jnp.broadcast_to(att_p[:, None, :], (B, 8, 2 * Cp))
    cat_p = jnp.zeros((B, Cp), f32).at[:, :Cout].set(cat)
    cat_in = jnp.broadcast_to(cat_p[:, None, :], (B, 8, Cp))

    # ---- pass 3: spatial attention + sigmoid + category attention ----
    out_flat = pl.pallas_call(
        functools.partial(_attend_kernel, cp=Cp),
        out_shape=jax.ShapeDtypeStruct((R, Cp), f32),
        grid_spec=pltpu.PrefetchScalarGridSpec(
            num_scalar_prefetch=0,
            grid=(B, n_hw),
            in_specs=[pl.BlockSpec((TILE, 2 * Cp),
                                   lambda bi, ti: (bi * n_hw + ti, 0)),
                      pl.BlockSpec((1, 8, 2 * Cp), lambda bi, ti: (bi, 0, 0)),
                      pl.BlockSpec((1, 8, Cp), lambda bi, ti: (bi, 0, 0))],
            out_specs=pl.BlockSpec((TILE, Cp),
                                   lambda bi, ti: (bi * n_hw + ti, 0))),
        compiler_params=pltpu.CompilerParams(
            dimension_semantics=("parallel", "parallel"),
            vmem_limit_bytes=vmem_limit),
        cost_estimate=pl.CostEstimate(
            flops=int(6 * R * Cp),
            transcendentals=int(R * Cp),
            bytes_accessed=int(R * 2 * Cp * 4 + R * Cp * 4)),
    )(y12, att_in, cat_in)

    out = out_flat.reshape(B, H, W, Cp)[..., :Cout]
    return jnp.transpose(out, (0, 3, 1, 2))


# --------------------------------------------------------------------------
# Plain-JAX reference (direct transcription of the PyTorch forward)
# --------------------------------------------------------------------------
def multiscale_encoder_ref(x, p, *, rate=1, eps=_EPS):
    f32 = jnp.float32
    B, Cin, H, W = x.shape
    Cout = p["w1"].shape[0]
    xn = jnp.transpose(x, (0, 2, 3, 1)).astype(f32)
    xb = xn.astype(jnp.bfloat16).astype(f32)          # match kernel's bf16 conv inputs
    w1 = p["w1"].astype(jnp.bfloat16).astype(f32)
    w2 = p["w2"].astype(jnp.bfloat16).astype(f32)

    conv1 = jnp.einsum("nhwc,oc->nhwo", xb, w1) + p["b1"]
    r = rate
    xpad = jnp.pad(xb, ((0, 0), (r, r), (r, r), (0, 0)))
    conv3 = jnp.zeros((B, H, W, Cout), f32) + p["b2"]
    for ky in range(3):
        for kx in range(3):
            conv3 = conv3 + jnp.einsum(
                "nhwc,oc->nhwo",
                xpad[:, ky * r:ky * r + H, kx * r:kx * r + W, :],
                w2[:, :, ky, kx])

    def bn_relu(y, g, be):
        m = jnp.mean(y, axis=(0, 1, 2))
        v = jnp.mean((y - m) ** 2, axis=(0, 1, 2))
        return jnp.maximum((y - m) * jax.lax.rsqrt(v + eps) * g + be, 0.0)

    fuse = bn_relu(conv1, p["g1"], p["be1"]) + bn_relu(conv3, p["g2"], p["be2"])
    gp = jnp.mean(fuse, axis=(1, 2))                          # (B, Cout)
    v_pre = gp @ p["wfc"].T
    vm = jnp.mean(v_pre, axis=0)
    vv = jnp.mean((v_pre - vm) ** 2, axis=0)
    v = jnp.maximum((v_pre - vm) * jax.lax.rsqrt(vv + eps) * p["gfc"] + p["bfc"], 0.0)
    v1 = v @ p["wfc1"].T
    v2 = v @ p["wfc2"].T
    att = jax.nn.softmax(jnp.stack([v1, v2], axis=1), axis=1)  # (B,2,Cout)
    s = (conv1 * att[:, 0][:, None, None, :]
         + conv3 * att[:, 1][:, None, None, :])
    spatial = 1.0 / (1.0 + jnp.exp(-s))
    ca = jnp.mean(xn, axis=(1, 2))
    cm = jnp.max(xn, axis=(1, 2))
    cat = 1.0 / (1.0 + jnp.exp(-((ca + cm) @ p["wcat"].T + 2.0 * p["bcat"])))
    out = spatial + cat[:, None, None, :]
    return jnp.transpose(out, (0, 3, 1, 2))


if __name__ == "__main__":
    # Small shapes consistent with the module: dim_in=4, dim_out=64, 16x16, rate=1.
    B, Cin, Cout, H, W, rate = 2, 4, 64, 16, 16, 1
    dim_min = max(Cout // 4, 32)
    f32 = jnp.float32
    key = jax.random.PRNGKey(0)
    ks = jax.random.split(key, 16)

    x = jax.random.normal(ks[0], (B, Cin, H, W), dtype=f32)
    params = dict(
        w1=0.2 * jax.random.normal(ks[1], (Cout, Cin), f32),       # Conv2d 1x1 (bias=True)
        b1=0.1 * jax.random.normal(ks[2], (Cout,), f32),
        g1=1.0 + 0.1 * jax.random.normal(ks[3], (Cout,), f32),     # BN1 affine
        be1=0.1 * jax.random.normal(ks[4], (Cout,), f32),
        w2=0.1 * jax.random.normal(ks[5], (Cout, Cin, 3, 3), f32), # Conv2d 3x3 dilated
        b2=0.1 * jax.random.normal(ks[6], (Cout,), f32),
        g2=1.0 + 0.1 * jax.random.normal(ks[7], (Cout,), f32),     # BN2 affine
        be2=0.1 * jax.random.normal(ks[8], (Cout,), f32),
        wfc=0.2 * jax.random.normal(ks[9], (dim_min, Cout), f32),  # fc 1x1 (no bias) + BN
        gfc=1.0 + 0.1 * jax.random.normal(ks[10], (dim_min,), f32),
        bfc=0.1 * jax.random.normal(ks[11], (dim_min,), f32),
        wfc1=0.2 * jax.random.normal(ks[12], (Cout, dim_min), f32),
        wfc2=0.2 * jax.random.normal(ks[13], (Cout, dim_min), f32),
        wcat=0.2 * jax.random.normal(ks[14], (Cout, Cin), f32),    # category_fc
        bcat=0.1 * jax.random.normal(ks[15], (Cout,), f32),
    )

    out = multiscale_encoder(x, params, rate=rate)
    out = jax.block_until_ready(out)

    ref = multiscale_encoder_ref(x, params, rate=rate)
    assert out.shape == (B, Cout, H, W), out.shape
    max_err = float(jnp.max(jnp.abs(out - ref)))
    assert jnp.allclose(out, ref, atol=2e-3, rtol=2e-3), f"mismatch, max|diff|={max_err}"
    print("KERNEL_OK")
</pallas_src>

<mosaic_0001>
module attributes {stable_mosaic.version = 11 : i64} {
  func.func @_conv_stats_kernel(%arg0: i32, %arg1: memref<256x48xbf16, #tpu.memory_space<vmem>>, %arg2: memref<48x256xbf16, #tpu.memory_space<vmem>>, %arg3: memref<1x256xf32, #tpu.memory_space<vmem>>, %arg4: memref<256x256xf32, #tpu.memory_space<vmem>>, %arg5: memref<1x8x256xf32, #tpu.memory_space<vmem>>) attributes {dimension_semantics = [#tpu.dimension_semantics<parallel>], iteration_bounds = array<i64: 2>, scalar_prefetch = 0 : i64, scratch_operands = 0 : i64, tpu.core_type = #tpu.core_type<tc>, window_params = [{transform_indices = @transform_0, window_bounds = array<i64: 256, 48>}, {pipeline_mode = #tpu.pipeline_mode<synchronous>, transform_indices = @transform_1, window_bounds = array<i64: 48, 256>}, {pipeline_mode = #tpu.pipeline_mode<synchronous>, transform_indices = @transform_2, window_bounds = array<i64: 1, 256>}, {transform_indices = @transform_3, window_bounds = array<i64: 256, 256>}, {transform_indices = @transform_4, window_bounds = array<i64: 1, 8, 256>}]} {
    %c0 = arith.constant 0 : index
    %c0_0 = arith.constant 0 : index
    %0 = vector.load %arg1[%c0, %c0_0] : memref<256x48xbf16, #tpu.memory_space<vmem>>, vector<256x48xbf16>
    %c0_1 = arith.constant 0 : index
    %c0_2 = arith.constant 0 : index
    %1 = vector.load %arg2[%c0_1, %c0_2] : memref<48x256xbf16, #tpu.memory_space<vmem>>, vector<48x256xbf16>
    %cst = arith.constant dense<0.000000e+00> : vector<256x256xf32>
    %2 = tpu.matmul %0, %1, %cst {dimension_numbers = #tpu.dot_dimension_numbers<[1], [0], [0], [1], [0, 0, 1, 1], [], []>} : vector<256x48xbf16>, vector<48x256xbf16>, vector<256x256xf32> -> vector<256x256xf32>
    %c0_3 = arith.constant 0 : index
    %c0_4 = arith.constant 0 : index
    %3 = vector.load %arg3[%c0_3, %c0_4] : memref<1x256xf32, #tpu.memory_space<vmem>>, vector<1x256xf32>
    %4 = vector.broadcast %3 : vector<1x256xf32> to vector<256x256xf32>
    %5 = arith.addf %2, %4 : vector<256x256xf32>
    %c0_5 = arith.constant 0 : index
    %c0_6 = arith.constant 0 : index
    %6 = vector.load %arg4[%c0_5, %c0_6] : memref<256x256xf32, #tpu.memory_space<vmem>>, vector<256x256xf32>
    tpu.vector_store %arg4[%c0_5, %c0_6], %5 {strides = array<i32>} : memref<256x256xf32, #tpu.memory_space<vmem>>, vector<256x256xf32>,
    %cst_7 = arith.constant dense<0.000000e+00> : vector<256xf32>
    %7 = vector.multi_reduction <add>, %5, %cst_7 [0] : vector<256x256xf32> to vector<256xf32>
    %8 = vector.shape_cast %7 : vector<256xf32> to vector<1x256xf32>
    %9 = arith.mulf %5, %5 : vector<256x256xf32>
    %cst_8 = arith.constant dense<0.000000e+00> : vector<256xf32>
    %10 = vector.multi_reduction <add>, %9, %cst_8 [0] : vector<256x256xf32> to vector<256xf32>
    %11 = vector.shape_cast %10 : vector<256xf32> to vector<1x256xf32>
    %cst_9 = arith.constant 0.000000e+00 : f32
    %12 = vector.broadcast %cst_9 : f32 to vector<6x256xf32>
    %13 = tpu.concatenate %8, %11, %12 in 0 : vector<1x256xf32>, vector<1x256xf32>, vector<6x256xf32> -> vector<8x256xf32>
    %14 = vector.shape_cast %13 : vector<8x256xf32> to vector<1x8x256xf32>
    %c0_10 = arith.constant 0 : index
    %c0_11 = arith.constant 0 : index
    %c0_12 = arith.constant 0 : index
    %15 = vector.load %arg5[%c0_10, %c0_11, %c0_12] : memref<1x8x256xf32, #tpu.memory_space<vmem>>, vector<1x8x256xf32>
    tpu.vector_store %arg5[%c0_10, %c0_11, %c0_12], %14 {strides = array<i32>} : memref<1x8x256xf32, #tpu.memory_space<vmem>>, vector<1x8x256xf32>,
    return
  }
  func.func @transform_0(%arg0: i32) -> (i32, i32) {
    %c0_i32 = arith.constant 0 : i32
    %c0_i32_0 = arith.constant 0 : i32
    return %arg0, %c0_i32 : i32, i32
  }
  func.func @transform_1(%arg0: i32) -> (i32, i32) {
    %c0_i32 = arith.constant 0 : i32
    %c0_i32_0 = arith.constant 0 : i32
    %c0_i32_1 = arith.constant 0 : i32
    return %c0_i32, %c0_i32_0 : i32, i32
  }
  func.func @transform_2(%arg0: i32) -> (i32, i32) {
    %c0_i32 = arith.constant 0 : i32
    %c0_i32_0 = arith.constant 0 : i32
    %c0_i32_1 = arith.constant 0 : i32
    return %c0_i32, %c0_i32_0 : i32, i32
  }
  func.func @transform_3(%arg0: i32) -> (i32, i32) {
    %c0_i32 = arith.constant 0 : i32
    %c0_i32_0 = arith.constant 0 : i32
    return %arg0, %c0_i32 : i32, i32
  }
  func.func @transform_4(%arg0: i32) -> (i32, i32, i32) {
    %c0_i32 = arith.constant 0 : i32
    %c0_i32_0 = arith.constant 0 : i32
    %c0_i32_1 = arith.constant 0 : i32
    return %arg0, %c0_i32, %c0_i32_0 : i32, i32, i32
  }
}

</mosaic_0001>

<bundles_post_ra>
// kernel: tpu_custom_call.1
= control target key start
LH: loop header
LB: loop body
LE: loop exit
PB: predicated region body
PF: predicated region fallthrough
CT: control target
= control target key end

     0   :  { %10 = vsyncpa [#allocation3], 0  ;;  %s1821_s0 = inlined_call_operand.vmem [shape: bf16[512,48], index: 0, kind: input, shape index: {}]   ;;  %s1822_s1 = inlined_call_operand.vmem [shape: bf16[48,256], index: 1, kind: input, shape index: {}]   ;;  %s1823_s2 = inlined_call_operand.vmem [shape: f32[1,256], index: 2, kind: input, shape index: {}]   ;;  %s1824_s3 = inlined_call_operand.hbm [shape: f32[512,256], index: 3, kind: output, shape index: {0}]   ;;  %s1825_s4 = inlined_call_operand.hbm [shape: f32[2,8,256], index: 4, kind: output, shape index: {1}]  }
   0x1   :  { %12 = vsyncpa [#allocation3 + $0x1], 0 }
   0x2   :  { %13 = vsyncpa [#allocation5], 0 }
   0x3   :  { %15 = vsyncpa [#allocation5 + $0x1], 0  ;;  %s1287_s15 = smov 0   ;;  %s1289_s16 = smov 0  }
   0x4   :  { %s1291_s17 = smov 0   ;;  %s1293_s18 = smov 0  }
   0x5 LB: > { %s1308_s19 = sadd.s32 4294967295, %s1255_s18   ;;  %s1025_s20 = sadd.s32 4294967294, %s1255_s18   ;;  %s1255_s18 = sphi %s1293_s18, %s1831_s18   ;;  %s1251_s17 = sphi %s1291_s17, %s1830_s17   ;;  %s1247_s16 = sphi %s1289_s16, %s1829_s16   ;;  %s1243_s15 = sphi %s1287_s15, %s1828_s15  }
   0x6   : > { %s1312_s21 = sadd.s32 1, %s1255_s18   ;;  %s96_s22 = sadd.s32 1, %s1251_s17 }
   0x7   : > { %s93_s23 = ssub.s32 %s1255_s18, %s1312_s21  ;;  %p106_p0 = scmp.ne.s32.totalorder %s1251_s17, %s1247_s16 }
   0x8   : > { %p94_p1 = scmp.eq.s32.totalorder %s93_s23, 0  ;;  %p107_p2 = scmp.eq.s32.totalorder %s1308_s19, 1 }
   0x9   : > { %p112_p3 = scmp.ne.s32.totalorder %s1247_s16, %s1243_s15  ;;  %p113_p4 = scmp.eq.s32.totalorder %s1025_s20, 1 }
   0xa   : > { %s1323_s24 = scalar_select %p94_p1, %s1251_s17, %s96_s22  }
   0xb   : > { %p1325_p5 = por %p107_p2, %p106_p0  ;;  %p1329_p6 = por %p113_p4, %p112_p3 }
   0xc   : > { %p1028_p7 = scmp.ge.s32.totalorder %s1255_s18, 1  ;;  %p172_p8 = scmp.lt.s32.totalorder %s1255_s18, 3 }
   0xe   : > { %p173_p9 = pnand %p1028_p7, %p172_p8 }
   0xf   : > { %v1136_v0 = vld [vmem:[%s1822_s1 + $0x4] ss:$8 sps:$4 sm:$0xff] (!%p173_p9)   ;;  %s1031_s29 = sshll.u32 (!%p173_p9), %s1308_s19, 5  ;;  %v1138_v1 = vld [vmem:[%s1822_s1] ss:$8 sps:$4 sm:$0xff] (!%p173_p9)   ;;  %v1257_v2 = vmov (!%p173_p9), 0   ;;  %v251_v23 = vlaneseq (!%p173_p9) }
  0x10   : > { %176 = sbr.rel (%p173_p9) target bundleno = 378 (0x17a), region = 32  ;;  %452 = vmatprep.mubr.bf16.mxu0 (!%p173_p9), %v1257_v2  ;;  %p204_p10 = scmp.lt.s32.totalorder (!%p173_p9), %s1031_s29, 63  ;;  %532 = vmatprep.mubr.bf16.mxu1 (!%p173_p9), %v1257_v2  ;;  %v1139_v3 = vld [vmem:[%s1822_s1 + $0x14] ss:$8 sps:$4 sm:$0xff] (!%p173_p9)   ;;  %v1141_v4 = vld [vmem:[%s1822_s1 + $0x10] ss:$8 sps:$4 sm:$0xff] (!%p173_p9)  }
  0x11   : > { %420 = vmatprep.subr.bf16.mxu0 (!%p173_p9), %v1136_v0  ;;  %1083 = vmatprep.subr.bf16.mxu1 (!%p173_p9), %v1136_v0  ;;  %v1142_v5 = vld [vmem:[%s1822_s1 + $0x24] ss:$8 sps:$4 sm:$0xff] (!%p173_p9)   ;;  %v1144_v6 = vld [vmem:[%s1822_s1 + $0x20] ss:$8 sps:$4 sm:$0xff] (!%p173_p9)   ;;  %vm371_vm0 = vcmask (!%p173_p9), 392192   ;;  %v252_v24 = vshrl.u32 (!%p173_p9), %v251_v23, 7 }
  0x12   : > { %421 = vmatpush1.bf16.msra.mxu0 (!%p173_p9), %v1138_v1  ;;  %1086 = vmatpush1.bf16.msra.mxu1 (!%p173_p9), %v1138_v1  ;;  %s1408_s27 = sand.u32 (!%p173_p9), 1, %s1247_s16   ;;  %v249_v26 = vld [vmem:[%s1823_s2] sm:$0x3] (!%p173_p9)  ;;  %s1081_s6 = sshll.u32 (!%p173_p9), %s1308_s19, 13 }
  0x13   : > { %422 = vmatprep.subr.bf16.mxu0 (!%p173_p9), %v1139_v3  ;;  %1084 = vmatprep.subr.bf16.mxu1 (!%p173_p9), %v1139_v3  ;;  %v253_v25 = vsub.s32 (!%p173_p9), 0, %v252_v24  ;;  %v257_v27 = vsub.s32 (!%p173_p9), 1, %v252_v24  ;;  %s1029_s30 = sshll.u32 (!%p173_p9), %s1408_s27, 9  ;;  %s1641_s10 = scalar_lea.hbm (!%p173_p9), %s1824_s3, %s1081_s6 }
  0x14   : > { %s1426_s5 = scalar_lea.vmem (!%p173_p9), [#allocation2], %s1029_s30  ;;  %s898_s11 = scalar_lea.sflag (!%p173_p9), [#allocation3], %s1408_s27 }
  0x15   : > { %v1414_v28 = vrot.slane (!%p173_p9), %v249_v26, %v253_v25  ;;  %v1416_v29 = vrot.slane (!%p173_p9), %v249_v26, %v257_v27  ;;  %s917_s7 = sshll.u32 (!%p173_p9), %s1426_s5, 4  ;;  %s1258_s13 = smov (!%p173_p9), [#allocation2]   ;;  %s1643_s7 = int_to_ptr.vmem [resolvable:$true] %s917_s7 }
  0x16   : > { %423 = vmatpush1.bf16.msra.mxu0 (!%p173_p9), %v1141_v4  ;;  %1087 = vmatpush1.bf16.msra.mxu1 (!%p173_p9), %v1141_v4  ;;  %s1165_s14 = sshll.u32 (!%p173_p9), %s1258_s13, 4  ;;  %s1166_s14 = int_to_ptr.vmem [resolvable:$false] %s1165_s14 }
  0x17   : > { %s1833_s29 = smov (!%p204_p10, %s1031_s29), 63  ;;  %424 = vmatprep.subr.bf16.mxu0 %v1142_v5  ;;  %1085 = vmatprep.subr.bf16.mxu1 %v1142_v5  ;;  %p1168_p0 = scmp.lt.s32.totalorder %s1643_s7, %s1166_s14 }
  0x18   : > { %s1032_s12 = sshll.u32 %s1833_s29, 2 }
  0x19   : > { %s1356_s20 = scalar_lea.vmem %s1821_s0, %s1032_s12  ;;  %s1161_s12 = scalar_lea.vmem %s1643_s7, 8192 }
  0x1a   : > { %v1145_v7 = vld [vmem:[%s1356_s20] sm:$0xff]   ;;  %425 = vmatpush1.bf16.msra.mxu0 %v1144_v6  ;;  %1088 = vmatpush1.bf16.msra.mxu1 %v1144_v6  ;;  %v1146_v9 = vld [vmem:[%s1356_s20 + $0x8] sm:$0xff]   ;;  %v1147_v11 = vld [vmem:[%s1356_s20 + $0x10] sm:$0xff]   ;;  %p1162_p11 = scmp.ne.s32.totalorder %s1643_s7, %s1161_s12 }
  0x1b   : > { %v1149_v8 = vld [vmem:[%s1356_s20 + $0x40] sm:$0xff]   ;;  %v1151_v10 = vld [vmem:[%s1356_s20 + $0x48] sm:$0xff]   ;;  %v1153_v12 = vld [vmem:[%s1356_s20 + $0x50] sm:$0xff]  }
  0x1c   : > { %v1148_v13 = vld [vmem:[%s1356_s20 + $0x18] sm:$0xff]   ;;  %v1150_v15 = vld [vmem:[%s1356_s20 + $0x20] sm:$0xff]   ;;  %v1152_v17 = vld [vmem:[%s1356_s20 + $0x28] sm:$0xff]   ;;  %p1163_p12 = pnand %p1162_p11, %p1325_p5 }
  0x1d   : > { %1055 = vmatmul.mubr.msk.bf16.vlgmr.msra.gmra.mrb[0].mxu0 %vm371_vm0, %v1145_v7  ;;  %1063 = vmatmul.mubr.msk.bf16.vlgmr.msra.gmra.mrb[0].mxu1 %vm371_vm0, %v1149_v8  ;;  %v1155_v14 = vld [vmem:[%s1356_s20 + $0x58] sm:$0xff]   ;;  %v1157_v16 = vld [vmem:[%s1356_s20 + $0x60] sm:$0xff]   ;;  %v1158_v18 = vld [vmem:[%s1356_s20 + $0x68] sm:$0xff]  }
  0x1e   : > { %462 = vmatprep.mubr.bf16.mxu0 %v1257_v2  ;;  %542 = vmatprep.mubr.bf16.mxu1 %v1257_v2  ;;  %v1154_v19 = vld [vmem:[%s1356_s20 + $0x30] sm:$0xff]   ;;  %v1156_v21 = vld [vmem:[%s1356_s20 + $0x38] sm:$0xff]   ;;  %p1164_p13 = pneg %p1163_p12 }
  0x1f   : > { %v1159_v20 = vld [vmem:[%s1356_s20 + $0x70] sm:$0xff]   ;;  %v1160_v22 = vld [vmem:[%s1356_s20 + $0x78] sm:$0xff]   ;;  %s1167_s20 = scalar_lea.vmem %s1166_s14, 16384 }
  0x20   : > { %p1169_p1 = scmp.lt.s32.totalorder %s1167_s20, %s1161_s12 }
  0x22   : > { %p1170_p2 = por %p1169_p1, %p1168_p0 }
  0x24   : > { %p1171_p3 = pnand %p1170_p2, %p1164_p13 }
  0x25   : > { %1056 = vmatmul.mubr.msk.bf16.gmra.mrb[4].mxu0 %vm371_vm0, %v1146_v9  ;;  %1064 = vmatmul.mubr.msk.bf16.gmra.mrb[4].mxu1 %vm371_vm0, %v1151_v10 }
  0x26   : > { %472 = vmatprep.mubr.bf16.mxu0 %v1257_v2  ;;  %552 = vmatprep.mubr.bf16.mxu1 %v1257_v2 }
  0x2d   : > { %1057 = vmatmul.mubr.msk.bf16.gmra.mrb[8].mxu0 %vm371_vm0, %v1147_v11  ;;  %1065 = vmatmul.mubr.msk.bf16.gmra.mrb[8].mxu1 %vm371_vm0, %v1153_v12 }
  0x2e   : > { %482 = vmatprep.mubr.bf16.mxu0 %v1257_v2  ;;  %562 = vmatprep.mubr.bf16.mxu1 %v1257_v2 }
  0x35   : > { %1058 = vmatmul.mubr.msk.bf16.gmra.mrb[12].mxu0 %vm371_vm0, %v1148_v13  ;;  %1066 = vmatmul.mubr.msk.bf16.gmra.mrb[12].mxu1 %vm371_vm0, %v1155_v14 }
  0x36   : > { %492 = vmatprep.mubr.bf16.mxu0 %v1257_v2  ;;  %572 = vmatprep.mubr.bf16.mxu1 %v1257_v2 }
  0x3d   : > { %1059 = vmatmul.mubr.msk.bf16.gmra.mrb[16].mxu0 %vm371_vm0, %v1150_v15  ;;  %1067 = vmatmul.mubr.msk.bf16.gmra.mrb[16].mxu1 %vm371_vm0, %v1157_v16 }
  0x3e   : > { %502 = vmatprep.mubr.bf16.mxu0 %v1257_v2  ;;  %582 = vmatprep.mubr.bf16.mxu1 %v1257_v2 }
  0x45   : > { %1060 = vmatmul.mubr.msk.bf16.gmra.mrb[20].mxu0 %vm371_vm0, %v1152_v17  ;;  %1068 = vmatmul.mubr.msk.bf16.gmra.mrb[20].mxu1 %vm371_vm0, %v1158_v18 }
  0x46   : > { %512 = vmatprep.mubr.bf16.mxu0 %v1257_v2  ;;  %592 = vmatprep.mubr.bf16.mxu1 %v1257_v2 }
  0x4d   : > { %1061 = vmatmul.mubr.msk.bf16.gmra.mrb[24].mxu0 %vm371_vm0, %v1154_v19  ;;  %1069 = vmatmul.mubr.msk.bf16.gmra.mrb[24].mxu1 %vm371_vm0, %v1159_v20 }
  0x4e   : > { %522 = vmatprep.mubr.bf16.mxu0 %v1257_v2  ;;  %602 = vmatprep.mubr.bf16.mxu1 %v1257_v2 }
  0x55   : > { %1062 = vmatmul.mubr.msk.bf16.gmra.mrb[28].mxu0 %vm371_vm0, %v1156_v21  ;;  %1070 = vmatmul.mubr.msk.bf16.gmra.mrb[28].mxu1 %vm371_vm0, %v1160_v22 }
  0xf0   : > { %v454_v30 = vpop.f32.mrb[0].mxu0  ;;  %v534_v31 = vpop.f32.mrb[0].mxu1 }
  0xf1   : > { %v455_v32 = vadd.f32 %v454_v30, %v1414_v28  ;;  %v456_v33 = vpop.f32.mrb[1].mxu0  ;;  %v1420_v34 = vadd.f32 %v534_v31, %v1414_v28  ;;  %v536_v35 = vpop.f32.mrb[1].mxu1 }
  0xf2   : > { %v457_v36 = vadd.f32 %v456_v33, %v1416_v29  ;;  %v458_v37 = vpop.f32.mrb[2].mxu0  ;;  %v1424_v38 = vadd.f32 %v536_v35, %v1416_v29  ;;  %v538_v39 = vpop.f32.mrb[2].mxu1 }
  0xf3   : > { %613 = vst [vmem:[%s1426_s5] sm:$0xff] %v455_v32  ;;  %v459_v40 = vadd.f32 %v458_v37, %v1414_v28  ;;  %v460_v41 = vpop.f32.mrb[3].mxu0  ;;  %645 = vst [vmem:[%s1426_s5 + $0x100] sm:$0xff] %v1420_v34  ;;  %v1433_v42 = vadd.f32 %v538_v39, %v1414_v28  ;;  %v540_v43 = vpop.f32.mrb[3].mxu1  ;;  %v751_v46 = vmul.f32 %v455_v32, %v455_v32 }
  0xf4   : > { %614 = vst [vmem:[%s1426_s5 + $0x8] sm:$0xff] %v457_v36  ;;  %v461_v44 = vadd.f32 %v460_v41, %v1416_v29  ;;  %646 = vst [vmem:[%s1426_s5 + $0x108] sm:$0xff] %v1424_v38  ;;  %v1440_v45 = vadd.f32 %v540_v43, %v1416_v29  ;;  %v752_v49 = vmul.f32 %v457_v36, %v457_v36 }
  0xf5   : > { %615 = vst [vmem:[%s1426_s5 + $0x10] sm:$0xff] %v459_v40  ;;  %v677_v47 = vadd.f32 %v459_v40, %v455_v32  ;;  %v753_v48 = vmul.f32 %v459_v40, %v459_v40  ;;  %647 = vst [vmem:[%s1426_s5 + $0x110] sm:$0xff] %v1433_v42 }
  0xf6   : > { %616 = vst [vmem:[%s1426_s5 + $0x18] sm:$0xff] %v461_v44  ;;  %v714_v50 = vadd.f32 %v461_v44, %v457_v36  ;;  %v754_v51 = vmul.f32 %v461_v44, %v461_v44  ;;  %648 = vst [vmem:[%s1426_s5 + $0x118] sm:$0xff] %v1440_v45 }
  0xf7   : > { %v815_v52 = vadd.f32 %v753_v48, %v751_v46 }
  0xf8   : > { %v852_v53 = vadd.f32 %v754_v51, %v752_v49  ;;  %v464_v54 = vpop.f32.mrb[4].mxu0  ;;  %v544_v55 = vpop.f32.mrb[4].mxu1 }
  0xf9   : > { %v465_v56 = vadd.f32 %v464_v54, %v1414_v28  ;;  %v466_v57 = vpop.f32.mrb[5].mxu0  ;;  %v1450_v58 = vadd.f32 %v544_v55, %v1414_v28  ;;  %v546_v59 = vpop.f32.mrb[5].mxu1 }
  0xfa   : > { %v467_v60 = vadd.f32 %v466_v57, %v1416_v29  ;;  %v468_v61 = vpop.f32.mrb[6].mxu0  ;;  %v1454_v62 = vadd.f32 %v546_v59, %v1416_v29  ;;  %v548_v63 = vpop.f32.mrb[6].mxu1 }
  0xfb   : > { %617 = vst [vmem:[%s1426_s5 + $0x20] sm:$0xff] %v465_v56  ;;  %v678_v0 = vadd.f32 %v677_v47, %v465_v56  ;;  %v755_v1 = vmul.f32 %v465_v56, %v465_v56  ;;  %v469_v2 = vadd.f32 %v468_v61, %v1414_v28  ;;  %v470_v3 = vpop.f32.mrb[7].mxu0  ;;  %649 = vst [vmem:[%s1426_s5 + $0x120] sm:$0xff] %v1450_v58  ;;  %v550_v4 = vpop.f32.mrb[7].mxu1 }
  0xfc   : > { %618 = vst [vmem:[%s1426_s5 + $0x28] sm:$0xff] %v467_v60  ;;  %v715_v5 = vadd.f32 %v714_v50, %v467_v60  ;;  %v756_v6 = vmul.f32 %v467_v60, %v467_v60  ;;  %v471_v7 = vadd.f32 %v470_v3, %v1416_v29  ;;  %650 = vst [vmem:[%s1426_s5 + $0x128] sm:$0xff] %v1454_v62 }
  0xfd   : > { %v816_v8 = vadd.f32 %v815_v52, %v755_v1  ;;  %619 = vst [vmem:[%s1426_s5 + $0x30] sm:$0xff] %v469_v2  ;;  %v679_v9 = vadd.f32 %v678_v0, %v469_v2  ;;  %v757_v10 = vmul.f32 %v469_v2, %v469_v2  ;;  %v1466_v11 = vadd.f32 %v548_v63, %v1414_v28 }
  0xfe   : > { %v853_v12 = vadd.f32 %v852_v53, %v756_v6  ;;  %620 = vst [vmem:[%s1426_s5 + $0x38] sm:$0xff] %v471_v7  ;;  %v716_v13 = vadd.f32 %v715_v5, %v471_v7  ;;  %v758_v14 = vmul.f32 %v471_v7, %v471_v7  ;;  %v1470_v15 = vadd.f32 %v550_v4, %v1416_v29 }
  0xff   : > { %v817_v16 = vadd.f32 %v816_v8, %v757_v10  ;;  %651 = vst [vmem:[%s1426_s5 + $0x130] sm:$0xff] %v1466_v11 }
 0x100   : > { %v854_v17 = vadd.f32 %v853_v12, %v758_v14  ;;  %v474_v18 = vpop.f32.mrb[8].mxu0  ;;  %652 = vst [vmem:[%s1426_s5 + $0x138] sm:$0xff] %v1470_v15  ;;  %v554_v19 = vpop.f32.mrb[8].mxu1 }
 0x101   : > { %v475_v20 = vadd.f32 %v474_v18, %v1414_v28  ;;  %v476_v21 = vpop.f32.mrb[9].mxu0  ;;  %v1478_v22 = vadd.f32 %v554_v19, %v1414_v28  ;;  %v556_v23 = vpop.f32.mrb[9].mxu1 }
 0x102   : > { %v477_v24 = vadd.f32 %v476_v21, %v1416_v29  ;;  %v478_v25 = vpop.f32.mrb[10].mxu0  ;;  %v1482_v26 = vadd.f32 %v556_v23, %v1416_v29  ;;  %v558_v27 = vpop.f32.mrb[10].mxu1 }
 0x103   : > { %621 = vst [vmem:[%s1426_s5 + $0x40] sm:$0xff] %v475_v20  ;;  %v680_v30 = vadd.f32 %v679_v9, %v475_v20  ;;  %v759_v31 = vmul.f32 %v475_v20, %v475_v20  ;;  %v479_v32 = vadd.f32 %v478_v25, %v1414_v28  ;;  %v480_v33 = vpop.f32.mrb[11].mxu0  ;;  %653 = vst [vmem:[%s1426_s5 + $0x140] sm:$0xff] %v1478_v22  ;;  %v560_v35 = vpop.f32.mrb[11].mxu1 }
 0x104   : > { %622 = vst [vmem:[%s1426_s5 + $0x48] sm:$0xff] %v477_v24  ;;  %v717_v36 = vadd.f32 %v716_v13, %v477_v24  ;;  %v760_v37 = vmul.f32 %v477_v24, %v477_v24  ;;  %v481_v39 = vadd.f32 %v480_v33, %v1416_v29  ;;  %654 = vst [vmem:[%s1426_s5 + $0x148] sm:$0xff] %v1482_v26 }
 0x105   : > { %v818_v40 = vadd.f32 %v817_v16, %v759_v31  ;;  %623 = vst [vmem:[%s1426_s5 + $0x50] sm:$0xff] %v479_v32  ;;  %v681_v41 = vadd.f32 %v680_v30, %v479_v32  ;;  %v761_v43 = vmul.f32 %v479_v32, %v479_v32  ;;  %v1494_v44 = vadd.f32 %v558_v27, %v1414_v28 }
 0x106   : > { %v855_v46 = vadd.f32 %v854_v17, %v760_v37  ;;  %624 = vst [vmem:[%s1426_s5 + $0x58] sm:$0xff] %v481_v39  ;;  %v718_v47 = vadd.f32 %v717_v36, %v481_v39  ;;  %v762_v48 = vmul.f32 %v481_v39, %v481_v39  ;;  %v1498_v49 = vadd.f32 %v560_v35, %v1416_v29 }
 0x107   : > { %v819_v50 = vadd.f32 %v818_v40, %v761_v43  ;;  %655 = vst [vmem:[%s1426_s5 + $0x150] sm:$0xff] %v1494_v44 }
 0x108   : > { %v856_v51 = vadd.f32 %v855_v46, %v762_v48  ;;  %v484_v52 = vpop.f32.mrb[12].mxu0  ;;  %656 = vst [vmem:[%s1426_s5 + $0x158] sm:$0xff] %v1498_v49  ;;  %v564_v53 = vpop.f32.mrb[12].mxu1 }
 0x109   : > { %v485_v54 = vadd.f32 %v484_v52, %v1414_v28  ;;  %v486_v55 = vpop.f32.mrb[13].mxu0  ;;  %v1506_v56 = vadd.f32 %v564_v53, %v1414_v28  ;;  %v566_v57 = vpop.f32.mrb[13].mxu1 }
 0x10a   : > { %v487_v59 = vadd.f32 %v486_v55, %v1416_v29  ;;  %v488_v60 = vpop.f32.mrb[14].mxu0  ;;  %v1510_v61 = vadd.f32 %v566_v57, %v1416_v29  ;;  %v568_v63 = vpop.f32.mrb[14].mxu1 }
 0x10b   : > { %625 = vst [vmem:[%s1426_s5 + $0x60] sm:$0xff] %v485_v54  ;;  %v682_v0 = vadd.f32 %v681_v41, %v485_v54  ;;  %v763_v1 = vmul.f32 %v485_v54, %v485_v54  ;;  %v489_v2 = vadd.f32 %v488_v60, %v1414_v28  ;;  %v490_v3 = vpop.f32.mrb[15].mxu0  ;;  %657 = vst [vmem:[%s1426_s5 + $0x160] sm:$0xff] %v1506_v56  ;;  %v570_v4 = vpop.f32.mrb[15].mxu1 }
 0x10c   : > { %626 = vst [vmem:[%s1426_s5 + $0x68] sm:$0xff] %v487_v59  ;;  %v719_v5 = vadd.f32 %v718_v47, %v487_v59  ;;  %v764_v6 = vmul.f32 %v487_v59, %v487_v59  ;;  %v491_v7 = vadd.f32 %v490_v3, %v1416_v29  ;;  %658 = vst [vmem:[%s1426_s5 + $0x168] sm:$0xff] %v1510_v61 }
 0x10d   : > { %v820_v8 = vadd.f32 %v819_v50, %v763_v1  ;;  %627 = vst [vmem:[%s1426_s5 + $0x70] sm:$0xff] %v489_v2  ;;  %v683_v9 = vadd.f32 %v682_v0, %v489_v2  ;;  %v765_v10 = vmul.f32 %v489_v2, %v489_v2  ;;  %v1522_v12 = vadd.f32 %v568_v63, %v1414_v28 }
 0x10e   : > { %v857_v13 = vadd.f32 %v856_v51, %v764_v6  ;;  %628 = vst [vmem:[%s1426_s5 + $0x78] sm:$0xff] %v491_v7  ;;  %v720_v14 = vadd.f32 %v719_v5, %v491_v7  ;;  %v766_v16 = vmul.f32 %v491_v7, %v491_v7  ;;  %v1526_v17 = vadd.f32 %v570_v4, %v1416_v29 }
 0x10f   : > { %v821_v18 = vadd.f32 %v820_v8, %v765_v10  ;;  %659 = vst [vmem:[%s1426_s5 + $0x170] sm:$0xff] %v1522_v12 }
 0x110   : > { %v858_v19 = vadd.f32 %v857_v13, %v766_v16  ;;  %v494_v20 = vpop.f32.mrb[16].mxu0  ;;  %660 = vst [vmem:[%s1426_s5 + $0x178] sm:$0xff] %v1526_v17  ;;  %v574_v21 = vpop.f32.mrb[16].mxu1 }
 0x111   : > { %v495_v23 = vadd.f32 %v494_v20, %v1414_v28  ;;  %v496_v24 = vpop.f32.mrb[17].mxu0  ;;  %v1534_v25 = vadd.f32 %v574_v21, %v1414_v28  ;;  %v576_v27 = vpop.f32.mrb[17].mxu1 }
 0x112   : > { %v497_v30 = vadd.f32 %v496_v24, %v1416_v29  ;;  %v498_v31 = vpop.f32.mrb[18].mxu0  ;;  %v1538_v32 = vadd.f32 %v576_v27, %v1416_v29  ;;  %v578_v33 = vpop.f32.mrb[18].mxu1 }
 0x113   : > { %629 = vst [vmem:[%s1426_s5 + $0x80] sm:$0xff] %v495_v23  ;;  %v684_v35 = vadd.f32 %v683_v9, %v495_v23  ;;  %v767_v36 = vmul.f32 %v495_v23, %v495_v23  ;;  %v499_v37 = vadd.f32 %v498_v31, %v1414_v28  ;;  %v500_v39 = vpop.f32.mrb[19].mxu0  ;;  %661 = vst [vmem:[%s1426_s5 + $0x180] sm:$0xff] %v1534_v25  ;;  %v580_v40 = vpop.f32.mrb[19].mxu1 }
 0x114   : > { %630 = vst [vmem:[%s1426_s5 + $0x88] sm:$0xff] %v497_v30  ;;  %v721_v41 = vadd.f32 %v720_v14, %v497_v30  ;;  %v768_v43 = vmul.f32 %v497_v30, %v497_v30  ;;  %v501_v46 = vadd.f32 %v500_v39, %v1416_v29  ;;  %662 = vst [vmem:[%s1426_s5 + $0x188] sm:$0xff] %v1538_v32 }
 0x115   : > { %v822_v47 = vadd.f32 %v821_v18, %v767_v36  ;;  %631 = vst [vmem:[%s1426_s5 + $0x90] sm:$0xff] %v499_v37  ;;  %v685_v48 = vadd.f32 %v684_v35, %v499_v37  ;;  %v769_v50 = vmul.f32 %v499_v37, %v499_v37  ;;  %v1550_v51 = vadd.f32 %v578_v33, %v1414_v28 }
 0x116   : > { %v859_v52 = vadd.f32 %v858_v19, %v768_v43  ;;  %632 = vst [vmem:[%s1426_s5 + $0x98] sm:$0xff] %v501_v46  ;;  %v722_v53 = vadd.f32 %v721_v41, %v501_v46  ;;  %v770_v54 = vmul.f32 %v501_v46, %v501_v46  ;;  %v1554_v55 = vadd.f32 %v580_v40, %v1416_v29 }
 0x117   : > { %v823_v57 = vadd.f32 %v822_v47, %v769_v50  ;;  %663 = vst [vmem:[%s1426_s5 + $0x190] sm:$0xff] %v1550_v51 }
 0x118   : > { %v860_v59 = vadd.f32 %v859_v52, %v770_v54  ;;  %v504_v60 = vpop.f32.mrb[20].mxu0  ;;  %664 = vst [vmem:[%s1426_s5 + $0x198] sm:$0xff] %v1554_v55  ;;  %v584_v63 = vpop.f32.mrb[20].mxu1 }
 0x119   : > { %v505_v0 = vadd.f32 %v504_v60, %v1414_v28  ;;  %v506_v1 = vpop.f32.mrb[21].mxu0  ;;  %v1562_v2 = vadd.f32 %v584_v63, %v1414_v28  ;;  %v586_v3 = vpop.f32.mrb[21].mxu1 }
 0x11a   : > { %v507_v4 = vadd.f32 %v506_v1, %v1416_v29  ;;  %v508_v5 = vpop.f32.mrb[22].mxu0  ;;  %v1566_v6 = vadd.f32 %v586_v3, %v1416_v29  ;;  %v588_v7 = vpop.f32.mrb[22].mxu1 }
 0x11b   : > { %633 = vst [vmem:[%s1426_s5 + $0xa0] sm:$0xff] %v505_v0  ;;  %v686_v8 = vadd.f32 %v685_v48, %v505_v0  ;;  %v771_v9 = vmul.f32 %v505_v0, %v505_v0  ;;  %v509_v10 = vadd.f32 %v508_v5, %v1414_v28  ;;  %v510_v13 = vpop.f32.mrb[23].mxu0  ;;  %665 = vst [vmem:[%s1426_s5 + $0x1a0] sm:$0xff] %v1562_v2  ;;  %v590_v14 = vpop.f32.mrb[23].mxu1 }
 0x11c   : > { %634 = vst [vmem:[%s1426_s5 + $0xa8] sm:$0xff] %v507_v4  ;;  %v723_v16 = vadd.f32 %v722_v53, %v507_v4  ;;  %v772_v18 = vmul.f32 %v507_v4, %v507_v4  ;;  %v511_v19 = vadd.f32 %v510_v13, %v1416_v29  ;;  %666 = vst [vmem:[%s1426_s5 + $0x1a8] sm:$0xff] %v1566_v6 }
 0x11d   : > { %v824_v20 = vadd.f32 %v823_v57, %v771_v9  ;;  %635 = vst [vmem:[%s1426_s5 + $0xb0] sm:$0xff] %v509_v10  ;;  %v687_v21 = vadd.f32 %v686_v8, %v509_v10  ;;  %v773_v23 = vmul.f32 %v509_v10, %v509_v10  ;;  %v1578_v24 = vadd.f32 %v588_v7, %v1414_v28 }
 0x11e   : > { %v861_v27 = vadd.f32 %v860_v59, %v772_v18  ;;  %636 = vst [vmem:[%s1426_s5 + $0xb8] sm:$0xff] %v511_v19  ;;  %v724_v30 = vadd.f32 %v723_v16, %v511_v19  ;;  %v774_v31 = vmul.f32 %v511_v19, %v511_v19  ;;  %v1582_v33 = vadd.f32 %v590_v14, %v1416_v29 }
 0x11f   : > { %v825_v35 = vadd.f32 %v824_v20, %v773_v23  ;;  %667 = vst [vmem:[%s1426_s5 + $0x1b0] sm:$0xff] %v1578_v24 }
 0x120   : > { %v862_v36 = vadd.f32 %v861_v27, %v774_v31  ;;  %v514_v37 = vpop.f32.mrb[24].mxu0  ;;  %668 = vst [vmem:[%s1426_s5 + $0x1b8] sm:$0xff] %v1582_v33  ;;  %v594_v39 = vpop.f32.mrb[24].mxu1 }
 0x121   : > { %v515_v40 = vadd.f32 %v514_v37, %v1414_v28  ;;  %v516_v41 = vpop.f32.mrb[25].mxu0  ;;  %v1590_v43 = vadd.f32 %v594_v39, %v1414_v28  ;;  %v596_v46 = vpop.f32.mrb[25].mxu1 }
 0x122   : > { %v517_v47 = vadd.f32 %v516_v41, %v1416_v29  ;;  %v518_v48 = vpop.f32.mrb[26].mxu0  ;;  %v1594_v50 = vadd.f32 %v596_v46, %v1416_v29  ;;  %v598_v52 = vpop.f32.mrb[26].mxu1 }
 0x123   : > { %637 = vst [vmem:[%s1426_s5 + $0xc0] sm:$0xff] %v515_v40  ;;  %v688_v53 = vadd.f32 %v687_v21, %v515_v40  ;;  %v775_v54 = vmul.f32 %v515_v40, %v515_v40  ;;  %v519_v57 = vadd.f32 %v518_v48, %v1414_v28  ;;  %v520_v59 = vpop.f32.mrb[27].mxu0  ;;  %669 = vst [vmem:[%s1426_s5 + $0x1c0] sm:$0xff] %v1590_v43  ;;  %v600_v60 = vpop.f32.mrb[27].mxu1 }
 0x124   : > { %638 = vst [vmem:[%s1426_s5 + $0xc8] sm:$0xff] %v517_v47  ;;  %v725_v63 = vadd.f32 %v724_v30, %v517_v47  ;;  %v776_v0 = vmul.f32 %v517_v47, %v517_v47  ;;  %v521_v1 = vadd.f32 %v520_v59, %v1416_v29  ;;  %670 = vst [vmem:[%s1426_s5 + $0x1c8] sm:$0xff] %v1594_v50 }
 0x125   : > { %v826_v3 = vadd.f32 %v825_v35, %v775_v54  ;;  %639 = vst [vmem:[%s1426_s5 + $0xd0] sm:$0xff] %v519_v57  ;;  %v689_v4 = vadd.f32 %v688_v53, %v519_v57  ;;  %v777_v5 = vmul.f32 %v519_v57, %v519_v57  ;;  %v1606_v7 = vadd.f32 %v598_v52, %v1414_v28 }
 0x126   : > { %v863_v8 = vadd.f32 %v862_v36, %v776_v0  ;;  %640 = vst [vmem:[%s1426_s5 + $0xd8] sm:$0xff] %v521_v1  ;;  %v726_v9 = vadd.f32 %v725_v63, %v521_v1  ;;  %v778_v10 = vmul.f32 %v521_v1, %v521_v1  ;;  %v1610_v13 = vadd.f32 %v600_v60, %v1416_v29 }
 0x127   : > { %v827_v14 = vadd.f32 %v826_v3, %v777_v5  ;;  %671 = vst [vmem:[%s1426_s5 + $0x1d0] sm:$0xff] %v1606_v7  ;;  %v784_v5 = vmul.f32 %v1424_v38, %v1424_v38 }
 0x128   : > { %v864_v16 = vadd.f32 %v863_v8, %v778_v10  ;;  %v524_v18 = vpop.f32.mrb[28].mxu0  ;;  %672 = vst [vmem:[%s1426_s5 + $0x1d8] sm:$0xff] %v1610_v13  ;;  %v604_v19 = vpop.f32.mrb[28].mxu1 }
 0x129   : > { %v525_v20 = vadd.f32 %v524_v18, %v1414_v28  ;;  %v526_v21 = vpop.f32.mrb[29].mxu0  ;;  %v1618_v23 = vadd.f32 %v604_v19, %v1414_v28  ;;  %v606_v27 = vpop.f32.mrb[29].mxu1 }
 0x12a   : > { %v527_v30 = vadd.f32 %v526_v21, %v1416_v29  ;;  %v528_v31 = vpop.f32.mrb[30].mxu0  ;;  %v1622_v35 = vadd.f32 %v606_v27, %v1416_v29  ;;  %v608_v36 = vpop.f32.mrb[30].mxu1 }
 0x12b   : > { %641 = vst [vmem:[%s1426_s5 + $0xe0] sm:$0xff] %v525_v20  ;;  %v690_v37 = vadd.f32 %v689_v4, %v525_v20  ;;  %v779_v39 = vmul.f32 %v525_v20, %v525_v20  ;;  %v529_v40 = vadd.f32 %v528_v31, %v1414_v28  ;;  %v530_v41 = vpop.f32.mrb[31].mxu0  ;;  %673 = vst [vmem:[%s1426_s5 + $0x1e0] sm:$0xff] %v1618_v23  ;;  %v610_v46 = vpop.f32.mrb[31].mxu1 }
 0x12c   : > { %642 = vst [vmem:[%s1426_s5 + $0xe8] sm:$0xff] %v527_v30  ;;  %v727_v47 = vadd.f32 %v726_v9, %v527_v30  ;;  %v780_v48 = vmul.f32 %v527_v30, %v527_v30  ;;  %v531_v52 = vadd.f32 %v530_v41, %v1416_v29  ;;  %674 = vst [vmem:[%s1426_s5 + $0x1e8] sm:$0xff] %v1622_v35 }
 0x12d   : > { %v828_v53 = vadd.f32 %v827_v14, %v779_v39  ;;  %643 = vst [vmem:[%s1426_s5 + $0xf0] sm:$0xff] %v529_v40  ;;  %v691_v54 = vadd.f32 %v690_v37, %v529_v40  ;;  %v781_v57 = vmul.f32 %v529_v40, %v529_v40  ;;  %v1636_v59 = vadd.f32 %v608_v36, %v1414_v28 }
 0x12e   : > { %v865_v60 = vadd.f32 %v864_v16, %v780_v48  ;;  %644 = vst [vmem:[%s1426_s5 + $0xf8] sm:$0xff] %v531_v52  ;;  %v728_v63 = vadd.f32 %v727_v47, %v531_v52  ;;  %v782_v0 = vmul.f32 %v531_v52, %v531_v52  ;;  %v1647_v1 = vadd.f32 %v610_v46, %v1416_v29 }
 0x12f   : > { %v783_v28 = vmul.f32 %v1420_v34, %v1420_v34  ;;  %v692_v3 = vadd.f32 %v691_v54, %v1420_v34  ;;  %v829_v4 = vadd.f32 %v828_v53, %v781_v57  ;;  %675 = vst [vmem:[%s1426_s5 + $0x1f0] sm:$0xff] %v1636_v59  ;;  %v785_v29 = vmul.f32 %v1433_v42, %v1433_v42 }
 0x130   : > { %v729_v8 = vadd.f32 %v728_v63, %v1424_v38  ;;  %v866_v9 = vadd.f32 %v865_v60, %v782_v0  ;;  %676 = vst [vmem:[%s1426_s5 + $0x1f8] sm:$0xff] %v1647_v1 }
 0x131   : > { %v693_v10 = vadd.f32 %v692_v3, %v1433_v42  ;;  %v830_v14 = vadd.f32 %v829_v4, %v783_v28 }
 0x132   : > { %1174 = shalt.err (!%p1171_p3)
}
 0x133   : > { %s1175_s22 = scalar_lea.hbm %s1641_s10, 8192  ;;  %s1179_s29 = scalar_lea.hbm %s1824_s3, 16384 }
 0x134   : > { %p1176_p4 = scmp.ne.s32.totalorder %s1641_s10, %s1175_s22  ;;  %p1180_p9 = scmp.lt.u32.totalorder %s1641_s10, %s1824_s3 }
 0x135   : > { %p1181_p10 = scmp.lt.u32.totalorder %s1179_s29, %s1175_s22  ;;  %p1183_p12 = scmp.lt.u32.totalorder %s1175_s22, %s1641_s10 }
 0x136   : > { %p1177_p7 = pnand %p1176_p4, %p1325_p5 }
 0x137   : > { %p1182_p11 = por %p1181_p10, %p1180_p9 }
 0x138   : > { %p1178_p8 = pneg %p1177_p7 }
 0x139   : > { %p1184_p13 = por %p1183_p12, %p1182_p11 }
 0x13b   : > { %p1185_p0 = pnand %p1184_p13, %p1178_p8 }
 0x13d   : > { %1188 = shalt.err (!%p1185_p0)
}
 0x13e   : > { %s1259_s6 = smov 256   ;;  %s1260_s8 = smov 16   ;;  %v786_v34 = vmul.f32 %v1440_v45, %v1440_v45  ;;  %v730_v38 = vadd.f32 %v729_v8, %v1440_v45  ;;  %v867_v42 = vadd.f32 %v866_v9, %v784_v5  ;;  %v787_v16 = vmul.f32 %v1450_v58, %v1450_v58 }
 0x13f   : > { %1089 = dma.vmem_to_hbm [thread:$0]  (%p1325_p5), %s1643_s7, 8192, %s1641_s10, %s898_s11, %s1259_s6, %s1259_s6, %s1260_s8   ;;  %v694_v18 = vadd.f32 %v693_v10, %v1450_v58  ;;  %v831_v19 = vadd.f32 %v830_v14, %v785_v29  ;;  %v788_v20 = vmul.f32 %v1454_v62, %v1454_v62  ;;  %v789_v30 = vmul.f32 %v1466_v11, %v1466_v11 }
 0x140   : > { %v731_v21 = vadd.f32 %v730_v38, %v1454_v62  ;;  %v868_v27 = vadd.f32 %v867_v42, %v786_v34  ;;  %v790_v45 = vmul.f32 %v1470_v15, %v1470_v15  ;;  %v791_v58 = vmul.f32 %v1478_v22, %v1478_v22  ;;  %s1030_s7 = sshll.u32 %s1408_s27, 4  ;;  %s1082_s9 = sshll.u32 %s1308_s19, 8 }
 0x141   : > { %v695_v31 = vadd.f32 %v694_v18, %v1466_v11  ;;  %v832_v36 = vadd.f32 %v831_v19, %v787_v16  ;;  %v792_v62 = vmul.f32 %v1482_v26, %v1482_v26  ;;  %v793_v11 = vmul.f32 %v1494_v44, %v1494_v44  ;;  %s202_s10 = scalar_lea.vmem [#allocation4], %s1030_s7  ;;  %s1778_s14 = scalar_lea.hbm %s1825_s4, %s1082_s9 }
 0x142   : > { %v732_v37 = vadd.f32 %v731_v21, %v1470_v15  ;;  %v869_v39 = vadd.f32 %v868_v27, %v788_v20  ;;  %v794_v15 = vmul.f32 %v1498_v49, %v1498_v49  ;;  %v799_v8 = vmul.f32 %v1534_v25, %v1534_v25  ;;  %s934_s11 = sshll.u32 %s202_s10, 4  ;;  %s903_s19 = scalar_lea.sflag [#allocation5], %s1408_s27  ;;  %s1780_s11 = int_to_ptr.vmem [resolvable:$true] %s934_s11 }
 0x143   : > { %v833_v40 = vadd.f32 %v832_v36, %v789_v30  ;;  %v696_v41 = vadd.f32 %v695_v31, %v1478_v22  ;;  %v795_v22 = vmul.f32 %v1506_v56, %v1506_v56  ;;  %v800_v29 = vmul.f32 %v1538_v32, %v1538_v32  ;;  %s1189_s20 = scalar_lea.vmem %s1780_s11, 256  ;;  %s1261_s22 = smov [#allocation4]  }
 0x144   : > { %v870_v46 = vadd.f32 %v869_v39, %v790_v45  ;;  %v733_v47 = vadd.f32 %v732_v37, %v1482_v26  ;;  %v796_v26 = vmul.f32 %v1510_v61, %v1510_v61  ;;  %v801_v34 = vmul.f32 %v1550_v51, %v1550_v51  ;;  %p1190_p1 = scmp.ne.s32.totalorder %s1780_s11, %s1189_s20  ;;  %s1193_s23 = sshll.u32 %s1261_s22, 4  ;;  %s1194_s23 = int_to_ptr.vmem [resolvable:$false] %s1193_s23 }
 0x145   : > { %v697_v48 = vadd.f32 %v696_v41, %v1494_v44  ;;  %v834_v52 = vadd.f32 %v833_v40, %v791_v58  ;;  %v797_v44 = vmul.f32 %v1522_v12, %v1522_v12  ;;  %v802_v42 = vmul.f32 %v1554_v55, %v1554_v55  ;;  %s1195_s28 = scalar_lea.vmem %s1194_s23, 512  ;;  %p1196_p4 = scmp.lt.s32.totalorder %s1780_s11, %s1194_s23 }
 0x146   : > { %v734_v53 = vadd.f32 %v733_v47, %v1498_v49  ;;  %v871_v54 = vadd.f32 %v870_v46, %v792_v62  ;;  %v798_v49 = vmul.f32 %v1526_v17, %v1526_v17  ;;  %v803_v18 = vmul.f32 %v1562_v2, %v1562_v2  ;;  %p1191_p2 = pnand %p1190_p1, %p1325_p5  ;;  %p1197_p7 = scmp.lt.s32.totalorder %s1195_s28, %s1189_s20 }
 0x147   : > { %v698_v57 = vadd.f32 %v697_v48, %v1506_v56  ;;  %v835_v60 = vadd.f32 %v834_v52, %v793_v11  ;;  %v804_v20 = vmul.f32 %v1566_v6, %v1566_v6  ;;  %v805_v27 = vmul.f32 %v1578_v24, %v1578_v24 }
 0x148   : > { %v735_v63 = vadd.f32 %v734_v53, %v1510_v61  ;;  %v872_v0 = vadd.f32 %v871_v54, %v794_v15  ;;  %v806_v31 = vmul.f32 %v1582_v33, %v1582_v33  ;;  %v807_v45 = vmul.f32 %v1590_v43, %v1590_v43  ;;  %p1192_p3 = pneg %p1191_p2  ;;  %p1198_p8 = por %p1197_p7, %p1196_p4 }
 0x149   : > { %v699_v28 = vadd.f32 %v698_v57, %v1522_v12  ;;  %v836_v3 = vadd.f32 %v835_v60, %v795_v22  ;;  %v808_v39 = vmul.f32 %v1594_v50, %v1594_v50  ;;  %v809_v40 = vmul.f32 %v1606_v7, %v1606_v7 }
 0x14a   : > { %v736_v4 = vadd.f32 %v735_v63, %v1526_v17  ;;  %v873_v5 = vadd.f32 %v872_v0, %v796_v26  ;;  %v812_v46 = vmul.f32 %v1622_v35, %v1622_v35  ;;  %v813_v15 = vmul.f32 %v1636_v59, %v1636_v59  ;;  %p1199_p9 = pnand %p1198_p8, %p1192_p3 }
 0x14b   : > { %v700_v56 = vadd.f32 %v699_v28, %v1534_v25  ;;  %v837_v9 = vadd.f32 %v836_v3, %v797_v44  ;;  %vm889_vm1 = vcmask 1040384   ;;  %vm892_vm2 = vcmask 1041408  }
 0x14c   : > { %v737_v61 = vadd.f32 %v736_v4, %v1538_v32  ;;  %v874_v10 = vadd.f32 %v873_v5, %v798_v49 }
 0x14d   : > { %v838_v12 = vadd.f32 %v837_v9, %v799_v8  ;;  %v701_v14 = vadd.f32 %v700_v56, %v1550_v51 }
 0x14e   : > { %v875_v17 = vadd.f32 %v874_v10, %v800_v29  ;;  %v738_v38 = vadd.f32 %v737_v61, %v1554_v55 }
 0x14f   : > { %v839_v25 = vadd.f32 %v838_v12, %v801_v34  ;;  %v702_v16 = vadd.f32 %v701_v14, %v1562_v2 }
 0x150   : > { %v876_v32 = vadd.f32 %v875_v17, %v802_v42  ;;  %v739_v19 = vadd.f32 %v738_v38, %v1566_v6 }
 0x151   : > { %v840_v21 = vadd.f32 %v839_v25, %v803_v18  ;;  %v703_v51 = vadd.f32 %v702_v16, %v1578_v24 }
 0x152   : > { %v877_v30 = vadd.f32 %v876_v32, %v804_v20  ;;  %v740_v55 = vadd.f32 %v739_v19, %v1582_v33  ;;  %v811_v33 = vmul.f32 %v1618_v23, %v1618_v23 }
 0x153   : > { %v841_v36 = vadd.f32 %v840_v21, %v805_v27  ;;  %v704_v2 = vadd.f32 %v703_v51, %v1590_v43  ;;  %v810_v43 = vmul.f32 %v1610_v13, %v1610_v13 }
 0x154   : > { %v878_v37 = vadd.f32 %v877_v30, %v806_v31  ;;  %v741_v6 = vadd.f32 %v740_v55, %v1594_v50 }
 0x155   : > { %v842_v58 = vadd.f32 %v841_v36, %v807_v45  ;;  %v705_v24 = vadd.f32 %v704_v2, %v1606_v7 }
 0x156   : > { %v879_v41 = vadd.f32 %v878_v37, %v808_v39  ;;  %v742_v62 = vadd.f32 %v741_v6, %v1610_v13  ;;  %v814_v13 = vmul.f32 %v1647_v1, %v1647_v1 }
 0x157   : > { %v843_v47 = vadd.f32 %v842_v58, %v809_v40  ;;  %v706_v50 = vadd.f32 %v705_v24, %v1618_v23 }
 0x158   : > { %v880_v11 = vadd.f32 %v879_v41, %v810_v43  ;;  %v743_v48 = vadd.f32 %v742_v62, %v1622_v35 }
 0x159   : > { %v844_v52 = vadd.f32 %v843_v47, %v811_v33  ;;  %v707_v7 = vadd.f32 %v706_v50, %v1636_v59 }
 0x15a   : > { %v881_v53 = vadd.f32 %v880_v11, %v812_v46  ;;  %v744_v54 = vadd.f32 %v743_v48, %v1647_v1 }
 0x15b   : > { %v708_v22 = vrot.slane %v707_v7, 4  ;;  %v845_v57 = vadd.f32 %v844_v52, %v813_v15 }
 0x15c   : > { %v745_v60 = vrot.slane %v744_v54, 4  ;;  %v882_v23 = vadd.f32 %v881_v53, %v814_v13 }
 0x15d   : > { %v709_v26 = vadd.f32 %v708_v22, %v707_v7  ;;  %v846_v63 = vrot.slane %v845_v57, 4 }
 0x15e   : > { %v746_v35 = vadd.f32 %v745_v60, %v744_v54  ;;  %v883_v0 = vrot.slane %v882_v23, 4 }
 0x15f   : > { %v710_v44 = vrot.slane %v709_v26, 2  ;;  %v847_v28 = vadd.f32 %v846_v63, %v845_v57 }
 0x160   : > { %v747_v3 = vrot.slane %v746_v35, 2  ;;  %v884_v49 = vadd.f32 %v883_v0, %v882_v23 }
 0x161   : > { %v711_v59 = vadd.f32 %v710_v44, %v709_v26  ;;  %v848_v4 = vrot.slane %v847_v28, 2 }
 0x162   : > { %v748_v5 = vadd.f32 %v747_v3, %v746_v35  ;;  %v885_v56 = vrot.slane %v884_v49, 2 }
 0x163   : > { %v712_v8 = vrot.slane %v711_v59, 1  ;;  %v849_v1 = vadd.f32 %v848_v4, %v847_v28 }
 0x164   : > { %v749_v9 = vrot.slane %v748_v5, 1  ;;  %v886_v61 = vadd.f32 %v885_v56, %v884_v49 }
 0x165   : > { %v850_v29 = vrot.slane %v849_v1, 1  ;;  %v713_v12 = vadd.f32 %v712_v8, %v711_v59 }
 0x166   : > { %v887_v10 = vrot.slane %v886_v61, 1  ;;  %v750_v34 = vadd.f32 %v749_v9, %v748_v5 }
 0x167   : > { %v851_v14 = vadd.f32 %v850_v29, %v849_v1 }
 0x168   : > { %v888_v17 = vadd.f32 %v887_v10, %v886_v61 }
 0x169   : > { %v890_v38 = vsel %vm889_vm1, %v713_v12, %v851_v14 }
 0x16a   : > { %v891_v42 = vsel %vm889_vm1, %v750_v34, %v888_v17  ;;  %v893_v25 = vsel %vm892_vm2, %v890_v38, 0.0 }
 0x16b   : > { %v894_v16 = vsel %vm892_vm2, %v891_v42, 0.0  ;;  %895 = vst [vmem:[%s202_s10] sm:$0xff] %v893_v25 }
 0x16c   : > { %896 = vst [vmem:[%s202_s10 + $0x8] sm:$0xff] %v894_v16 }
 0x16d   : > { %1202 = shalt.err (!%p1199_p9)
}
 0x16e   : > { %s1203_s27 = scalar_lea.hbm %s1778_s14, 256  ;;  %s1207_s5 = scalar_lea.hbm %s1825_s4, 512 }
 0x16f   : > { %p1204_p10 = scmp.ne.s32.totalorder %s1778_s14, %s1203_s27  ;;  %p1208_p13 = scmp.lt.u32.totalorder %s1778_s14, %s1825_s4 }
 0x170   : > { %p1209_p0 = scmp.lt.u32.totalorder %s1207_s5, %s1203_s27  ;;  %p1211_p2 = scmp.lt.u32.totalorder %s1203_s27, %s1778_s14 }
 0x171   : > { %p1205_p11 = pnand %p1204_p10, %p1325_p5 }
 0x172   : > { %p1210_p1 = por %p1209_p0, %p1208_p13 }
 0x173   : > { %p1206_p12 = pneg %p1205_p11 }
 0x174   : > { %p1212_p3 = por %p1211_p2, %p1210_p1 }
 0x176   : > { %p1213_p4 = pnand %p1212_p3, %p1206_p12 }
 0x178   : > { %1216 = shalt.err (!%p1213_p4)
}
 0x179   : > { %1090 = dma.vmem_to_hbm [thread:$0]  (%p1325_p5), %s1780_s11, 256, %s1778_s14, %s903_s19  }
 0x17a PF: > { %p1100_p7 = scmp.ge.s32.totalorder %s1255_s18, 2  ;;  %s946_s7 = sand.u32 1, %s1243_s15  }
 0x17b   : > { %s947_s9 = scalar_lea.sflag [#allocation3], %s946_s7 }
 0x17c   : > { %p1094_p8 = pnand %p1100_p7, %p1329_p6 }
 0x17e   : > { %1234 = dma.done.wait (!%p1094_p8), %s947_s9, 8192  }
 0x17f   : > { %1236 = vsyncadd (!%p1094_p8), %s947_s9, 4294959104  ;;  %s956_s10 = scalar_lea.sflag [#allocation5], %s946_s7 }
 0x180   : > { %1238 = dma.done.wait (!%p1094_p8), %s956_s10, 256  }
 0x181   : > { %1240 = vsyncadd (!%p1094_p8), %s956_s10, 4294967040  ;;  %p18_p5 = scmp.ge.s32.totalorder %s1312_s21, 4   ;;  %s1828_s15 = smov %s1247_s16 }
 0x182   : > { %s1829_s16 = smov %s1251_s17  ;;  %s1830_s17 = smov %s1323_s24 }
 0x183   : > { %s1831_s18 = smov %s1312_s21  ;;  %20 = sbr.rel (!%p18_p5) target bundleno = 5 (0x5), region = 84 }
 0x18a   :  { %961 = vsyncpa [#allocation3], 1 }
 0x18b   :  { %963 = vsyncpa [#allocation3 + $0x1], 1 }
 0x18c   :  { %964 = vsyncpa [#allocation5], 1 }
 0x18d   :  { %966 = vsyncpa [#allocation5 + $0x1], 1 }

</bundles_post_ra>
